<compile_context>
chip_gen: v6e
topology: v6e:2x2x1
jax: 0.10.0
libtpu: 0.0.40
codegen_flags: <defaults>
</compile_context>

<pallas_src>
import functools

import jax
import jax.numpy as jnp
from jax.experimental import pallas as pl
from jax.experimental.pallas import tpu as pltpu

_LANE = 128


def _round_up(a: int, b: int) -> int:
    return ((a + b - 1) // b) * b


def _sublane_min(itemsize: int) -> int:
    if itemsize >= 4:
        return 8
    if itemsize == 2:
        return 16
    return 32


def _tpu_config():
    """Returns (target_block_bytes, vmem_limit_bytes, multi_tc, bf16_native)."""
    kind = ""
    try:
        kind = jax.devices()[0].device_kind.lower()
    except Exception:  # pragma: no cover - defensive; fall back to conservative.
        pass
    if "v7" in kind:
        # 2 TCs/chip, ~3.2 TB/s HBM, 64 MiB VMEM/TC: 8 MiB blocks (32 MiB
        # double-buffered in+out), vmem limit well under physical.
        return 8 << 20, 48 << 20, True, True
    if "v6" in kind:
        # 1 TC, 128 MiB VMEM: 8 MiB blocks need the limit raised above the
        # 32 MiB scoped default.
        return 8 << 20, 48 << 20, False, True
    if "v5e" in kind or "v5 lite" in kind or "v5lite" in kind:
        # 1 TC, scoped VMEM default is only 16 MiB: 4 MiB blocks + explicit limit.
        return 4 << 20, 32 << 20, False, False
    # Unknown / older generations: conservative settings.
    return 4 << 20, 32 << 20, False, False


def _scale_kernel(factor_ref, x_ref, o_ref, *, upcast: bool):
    x = x_ref[...]
    f = factor_ref[0]  # f32 scalar in SMEM via scalar prefetch (no recompile per value)
    if upcast:
        o_ref[...] = (x.astype(jnp.float32) * f).astype(o_ref.dtype)
    else:
        o_ref[...] = x * f.astype(x.dtype)  # native-dtype VPU multiply


def scale(x: jax.Array, factor, *, min_pallas_bytes: int = 256 * 1024) -> jax.Array:
    """Apply `x * factor` via a Pallas TPU kernel. Shape/dtype preserving."""
    orig_shape = x.shape
    orig_dtype = x.dtype
    n = x.size
    if n == 0:
        return x

    nbytes = n * x.dtype.itemsize
    if nbytes < min_pallas_bytes:
        # Tiny activations: fixed pallas_call + pipeline setup cost dominates;
        # XLA's fused elementwise multiply is faster.
        return x * jnp.asarray(factor, dtype=orig_dtype)

    target_block_bytes, vmem_limit_bytes, multi_tc, bf16_native = _tpu_config()

    x_flat = jnp.ravel(x)

    # Lane width: widen when possible (longer contiguous DMA rows, wide vst).
    lane = _LANE
    for cand in (1024, 512, 256):
        if n % cand == 0:
            lane = cand
            break

    n_main = (n // lane) * lane
    if n_main == 0:  # fewer than `lane` elements: no kernel body worth running.
        return x * jnp.asarray(factor, dtype=orig_dtype)
    has_tail = n_main != n

    rows = n_main // lane
    x2d = (x_flat[:n_main] if has_tail else x_flat).reshape(rows, lane)

    itemsize = x.dtype.itemsize
    sub = _sublane_min(itemsize)
    # Byte-budgeted, dtype-aware block rows (~target_block_bytes per block).
    tile_rows = max(_round_up(target_block_bytes // (lane * itemsize), sub), sub)

    if rows > tile_rows:
        num_blocks = pl.cdiv(rows, tile_rows)
        if multi_tc and num_blocks > 1 and num_blocks % 2 == 1:
            num_blocks += 1  # even, balanced grid across v7x's 2 TensorCores
        tr = _round_up(pl.cdiv(rows, num_blocks), sub)
    elif multi_tc and rows >= 2 * sub:
        # Medium input on v7x: split into 2 balanced blocks so both TCs work.
        tr = _round_up(pl.cdiv(rows, 2), sub)
        if tr >= rows:
            tr = rows
    else:
        # Single-TC chips (v5e/v6e): one block, no extra grid-step overhead.
        tr = rows
    grid = (pl.cdiv(rows, tr),)

    native_ok = (orig_dtype == jnp.float32) or (orig_dtype == jnp.bfloat16 and bf16_native)
    upcast = not native_ok

    factor_arr = jnp.asarray([factor], dtype=jnp.float32)

    out2d = pl.pallas_call(
        functools.partial(_scale_kernel, upcast=upcast),
        out_shape=jax.ShapeDtypeStruct((rows, lane), orig_dtype),
        grid_spec=pltpu.PrefetchScalarGridSpec(
            num_scalar_prefetch=1,  # factor -> SMEM
            grid=grid,
            in_specs=[pl.BlockSpec((tr, lane), lambda i, f: (i, 0))],
            out_specs=pl.BlockSpec((tr, lane), lambda i, f: (i, 0)),
        ),
        compiler_params=pltpu.CompilerParams(
            dimension_semantics=("parallel",),
            vmem_limit_bytes=vmem_limit_bytes,
        ),
    )(factor_arr, x2d)

    out_flat = out2d.reshape(-1)
    if has_tail:
        # Peel the <lane tail outside the kernel (no full-array pad/slice pass).
        tail = x_flat[n_main:]
        tail_out = (tail.astype(jnp.float32) * jnp.float32(factor)).astype(orig_dtype)
        out_flat = jnp.concatenate([out_flat, tail_out])
    return out_flat.reshape(orig_shape)


if __name__ == "__main__":
    key = jax.random.PRNGKey(0)
    k1, k2, k3, k4 = jax.random.split(key, 4)

    # Typical NCHW activation: batch=2, channels=4, 16x16. Force kernel path.
    x = jax.random.normal(k1, (2, 4, 16, 16), dtype=jnp.float32)
    factor = 0.5  # deterministic "parameter" from Scale.__init__(factor)
    y = jax.block_until_ready(scale(x, factor, min_pallas_bytes=0))
    assert y.shape == x.shape and y.dtype == x.dtype
    assert jnp.allclose(y, x * factor, atol=1e-6, rtol=1e-6)

    # Ragged size (not a multiple of 128): kernel main body + peeled tail.
    x2 = jax.random.normal(k2, (3, 5, 7, 11), dtype=jnp.float32)
    y2 = jax.block_until_ready(scale(x2, 1.75, min_pallas_bytes=0))
    assert y2.shape == x2.shape and y2.dtype == x2.dtype
    assert jnp.allclose(y2, x2 * 1.75, atol=1e-6, rtol=1e-6)

    # bf16 input: native-dtype multiply on v6e/v7x, f32 upcast elsewhere.
    x3 = jax.random.normal(k3, (4, 8, 128), dtype=jnp.bfloat16)
    y3 = jax.block_until_ready(scale(x3, -2.0, min_pallas_bytes=0))
    assert y3.shape == x3.shape and y3.dtype == x3.dtype
    ref3 = (x3 * jnp.asarray(-2.0, jnp.bfloat16)).astype(jnp.float32)
    assert jnp.allclose(y3.astype(jnp.float32), ref3, atol=1e-2, rtol=1e-2)

    # Tiny tensor: default small-size fallback (no pallas_call).
    x4 = jax.random.normal(k4, (2, 3, 4), dtype=jnp.float32)
    y4 = jax.block_until_ready(scale(x4, 3.0))
    assert y4.shape == x4.shape and y4.dtype == x4.dtype
    assert jnp.allclose(y4, x4 * 3.0, atol=1e-6, rtol=1e-6)

    print("KERNEL_OK")
</pallas_src>

<mosaic_0001>
module attributes {stable_mosaic.version = 11 : i64} {
  func.func @_scale_kernel(%arg0: i32, %arg1: memref<1xf32, #tpu.memory_space<smem>>, %arg2: memref<2x1024xf32, #tpu.memory_space<vmem>>, %arg3: memref<2x1024xf32, #tpu.memory_space<vmem>>) attributes {dimension_semantics = [#tpu.dimension_semantics<parallel>], iteration_bounds = array<i64: 1>, scalar_prefetch = 1 : i64, scratch_operands = 0 : i64, tpu.core_type = #tpu.core_type<tc>, window_params = [{transform_indices = @transform_0, window_bounds = array<i64: 2, 1024>}, {transform_indices = @transform_1, window_bounds = array<i64: 2, 1024>}]} {
    %c0 = arith.constant 0 : index
    %c0_0 = arith.constant 0 : index
    %0 = vector.load %arg2[%c0, %c0_0] : memref<2x1024xf32, #tpu.memory_space<vmem>>, vector<2x1024xf32>
    %c0_1 = arith.constant 0 : index
    %1 = memref.load %arg1[%c0_1] : memref<1xf32, #tpu.memory_space<smem>>
    %2 = vector.broadcast %1 : f32 to vector<2x1024xf32>
    %3 = arith.mulf %0, %2 : vector<2x1024xf32>
    %c0_2 = arith.constant 0 : index
    %c0_3 = arith.constant 0 : index
    %4 = vector.load %arg3[%c0_2, %c0_3] : memref<2x1024xf32, #tpu.memory_space<vmem>>, vector<2x1024xf32>
    tpu.vector_store %arg3[%c0_2, %c0_3], %3 {strides = array<i32>} : memref<2x1024xf32, #tpu.memory_space<vmem>>, vector<2x1024xf32>,
    return
  }
  func.func @transform_0(%arg0: i32, %arg1: memref<1xf32, #tpu.memory_space<smem>>) -> (i32, i32) {
    %c0_i32 = arith.constant 0 : i32
    %c0_i32_0 = arith.constant 0 : i32
    return %arg0, %c0_i32 : i32, i32
  }
  func.func @transform_1(%arg0: i32, %arg1: memref<1xf32, #tpu.memory_space<smem>>) -> (i32, i32) {
    %c0_i32 = arith.constant 0 : i32
    %c0_i32_0 = arith.constant 0 : i32
    return %arg0, %c0_i32 : i32, i32
  }
}

</mosaic_0001>

<bundles_post_ra>
// kernel: tpu_custom_call.1
= control target key start
LH: loop header
LB: loop body
LE: loop exit
PB: predicated region body
PF: predicated region fallthrough
CT: control target
= control target key end

     0   :  { %8 = vsyncpa [#allocation5], 0  ;;  %s118_s0 = inlined_call_operand.<no memory space> [shape: f32[1], index: 0, kind: input, shape index: {}]   ;;  %s119_s1 = inlined_call_operand.hbm [shape: f32[2,1024], index: 1, kind: input, shape index: {}]   ;;  %s120_s2 = inlined_call_operand.hbm [shape: f32[2,1024], index: 2, kind: output, shape index: {}]  }
   0x1   :  { %9 = vsyncpa [#allocation6], 0  ;;  %s92_s9 = smov [#allocation4]  }
   0x2   :  { %s16_s10 = sshll.u32 %s92_s9, 4  ;;  %s17_s10 = int_to_ptr.vmem [resolvable:$true] %s16_s10 }
   0x3   :  { %s56_s11 = scalar_lea.vmem %s17_s10, 256  ;;  %p61_p1 = scmp.lt.s32.totalorder %s17_s10, %s17_s10 }
   0x4   :  { %p57_p0 = scmp.ne.s32.totalorder %s17_s10, %s56_s11  ;;  %p62_p2 = scmp.lt.s32.totalorder %s56_s11, %s56_s11 }
   0x6   :  { %p63_p3 = por %p62_p2, %p61_p1 }
   0x8   :  { %p64_p4 = pnand %p63_p3, %p57_p0 }
   0xa   :  { %67 = shalt.err (!%p64_p4)
}
   0xb   :  { %19 = dma.hbm_to_vmem [thread:$0]  %s119_s1, 256, %s17_s10, [#allocation5]  }
   0xc   :  { %88 = dma.done.wait [#allocation5], 256  }
   0xd   :  { %89 = vsyncadd [#allocation5], 4294967040  ;;  %v26_v0 = vstv %s118_s0  ;;  %s93_s16 = smov [#allocation7]   ;;  %v23_v1 = vld [vmem:[#allocation4] sm:$0xff]  ;;  %v24_v2 = vld [vmem:[#allocation4 + $0x8] sm:$0xff] }
   0xe   :  { %s37_s17 = sshll.u32 %s93_s16, 4  ;;  %v27_v3 = vmul.f32 %v26_v0, %v23_v1  ;;  %v28_v4 = vmul.f32 %v26_v0, %v24_v2  ;;  %s38_s17 = int_to_ptr.vmem [resolvable:$true] %s37_s17 }
   0xf   :  { %s68_s18 = scalar_lea.vmem %s38_s17, 256  ;;  %p73_p6 = scmp.lt.s32.totalorder %s38_s17, %s38_s17 }
  0x10   :  { %29 = vst [vmem:[#allocation7] sm:$0xff] %v27_v3  ;;  %30 = vst [vmem:[#allocation7 + $0x8] sm:$0xff] %v28_v4  ;;  %p69_p5 = scmp.ne.s32.totalorder %s38_s17, %s68_s18  ;;  %p74_p7 = scmp.lt.s32.totalorder %s68_s18, %s68_s18 }
  0x12   :  { %p75_p8 = por %p74_p7, %p73_p6 }
  0x14   :  { %p76_p9 = pnand %p75_p8, %p69_p5 }
  0x16   :  { %79 = shalt.err (!%p76_p9)
}
  0x17   :  { %40 = dma.vmem_to_hbm [thread:$0]  %s38_s17, 256, %s120_s2, [#allocation6]  }
  0x18   :  { %90 = dma.done.wait [#allocation6], 256  }
  0x19   :  { %91 = vsyncadd [#allocation6], 4294967040 }
  0x1a   :  { %44 = vsyncpa [#allocation5], 1 }
  0x1b   :  { %45 = vsyncpa [#allocation6], 1 }

</bundles_post_ra>
